<compile_context>
chip_gen: v6e
topology: v6e:2x2x1
jax: 0.10.0
libtpu: 0.0.40
codegen_flags: <defaults>
</compile_context>

<pallas_src>
import functools

import numpy as np
import jax
import jax.numpy as jnp
from jax import lax
from jax.experimental import pallas as pl
from jax.experimental.pallas import tpu as pltpu


def gen_relative_position_index(window_size):
    """Numpy port of the PyTorch buffer construction (exact semantics)."""
    num_relative_distance = (2 * window_size[0] - 1) * (2 * window_size[1] - 1) + 3
    window_area = window_size[0] * window_size[1]
    # torch.meshgrid defaults to 'ij' indexing
    coords = np.stack(
        np.meshgrid(np.arange(window_size[0]), np.arange(window_size[1]), indexing="ij")
    )  # (2, Wh, Ww)
    coords_flatten = coords.reshape(2, -1)  # (2, Wh*Ww)
    relative_coords = coords_flatten[:, :, None] - coords_flatten[:, None, :]  # (2, A, A)
    relative_coords = relative_coords.transpose(1, 2, 0).copy()  # (A, A, 2)
    relative_coords[:, :, 0] += window_size[0] - 1
    relative_coords[:, :, 1] += window_size[1] - 1
    relative_coords[:, :, 0] *= 2 * window_size[1] - 1
    rpi = np.zeros((window_area + 1,) * 2, dtype=relative_coords.dtype)
    rpi[1:, 1:] = relative_coords.sum(-1)
    rpi[0, 0:] = num_relative_distance - 3
    rpi[0:, 0] = num_relative_distance - 2
    rpi[0, 0] = num_relative_distance - 1
    return rpi  # (A+1, A+1) int


def _bias_gather_kernel(table_ref, idx_ref, out_ref):
    # table_ref: (D, H)  f32  -- relative_position_bias_table (PyTorch layout)
    # idx_ref:   (1, NN) i32  -- flattened relative_position_index
    # out_ref:   (H, NN) f32  -- gathered bias, lane-dense on NN
    d = table_ref.shape[0]
    nn = idx_ref.shape[1]

    # Rebuild the 0/1 selector in-registers: column n has a single 1 at row
    # idx[n].  VPU iota + compare; no dense selector DMA from HBM.
    row = lax.broadcasted_iota(jnp.int32, (d, nn), 0)           # (D, NN) row index
    sel = (row == idx_ref[...]).astype(table_ref.dtype)          # (D, NN), exact 0/1

    # Gather-by-matmul on the MXU.  Contract D on both operands so the (D, H)
    # parameter is consumed transposed natively (no separate transpose op).
    out_ref[...] = lax.dot_general(
        table_ref[...],
        sel,
        dimension_numbers=(((0,), (0,)), ((), ())),
        preferred_element_type=jnp.float32,
    ).astype(out_ref.dtype)


@functools.partial(jax.jit, static_argnums=(2,))
def relative_position_bias_pallas(table, idx_flat, n_tokens):
    """table:    (num_relative_distance, num_heads) f32 parameter (PyTorch layout)
    idx_flat: (1, n_tokens*n_tokens) int32 flattened relative_position_index
    Returns (num_heads, n_tokens, n_tokens) f32, matching the PyTorch forward()."""
    d, h = table.shape
    nn = n_tokens * n_tokens
    assert idx_flat.shape == (1, nn)

    out = pl.pallas_call(
        _bias_gather_kernel,
        out_shape=jax.ShapeDtypeStruct((h, nn), table.dtype),
        in_specs=[
            pl.BlockSpec(memory_space=pltpu.MemorySpace.VMEM),
            pl.BlockSpec(memory_space=pltpu.MemorySpace.VMEM),
        ],
        out_specs=pl.BlockSpec(memory_space=pltpu.MemorySpace.VMEM),
    )(table, idx_flat)

    # Free row-major reshape -- no permute/transpose op in this layout.
    return out.reshape(h, n_tokens, n_tokens)


if __name__ == "__main__":
    # Small module config: window_size=(4, 4), num_heads=8
    window_size = (4, 4)
    num_heads = 8
    window_area = window_size[0] * window_size[1]
    num_relative_distance = (2 * window_size[0] - 1) * (2 * window_size[1] - 1) + 3  # 52
    n_tokens = window_area + 1  # 17

    # Deterministic parameter init (PyTorch init is zeros; use small randoms so
    # the gather is actually exercised).
    key = jax.random.PRNGKey(0)
    table = 0.02 * jax.random.normal(
        key, (num_relative_distance, num_heads), dtype=jnp.float32
    )

    rpi = gen_relative_position_index(window_size)                    # (17, 17) int
    idx_flat = jnp.asarray(rpi.reshape(1, -1), dtype=jnp.int32)       # (1, 289) i32

    bias = relative_position_bias_pallas(table, idx_flat, n_tokens)
    bias = jax.block_until_ready(bias)

    # Reference check against pure-JAX gather (PyTorch forward semantics).
    ref = jnp.take(table, jnp.asarray(rpi.reshape(-1), dtype=jnp.int32), axis=0)
    ref = ref.reshape(n_tokens, n_tokens, num_heads).transpose(2, 0, 1)
    assert bias.shape == (num_heads, n_tokens, n_tokens)
    np.testing.assert_allclose(np.asarray(bias), np.asarray(ref), rtol=1e-6, atol=1e-6)

    print("KERNEL_OK")
</pallas_src>

<mosaic_0001>
module attributes {stable_mosaic.version = 11 : i64} {
  func.func @_bias_gather_kernel(%arg0: memref<52x8xf32, #tpu.memory_space<vmem>>, %arg1: memref<1x289xi32, #tpu.memory_space<vmem>>, %arg2: memref<8x289xf32, #tpu.memory_space<vmem>>) attributes {dimension_semantics = [], scalar_prefetch = 0 : i64, scratch_operands = 0 : i64, tpu.core_type = #tpu.core_type<tc>} {
    %0 = tpu.iota {dimensions = array<i32: 0>} : vector<52x289xi32>
    %c0 = arith.constant 0 : index
    %c0_0 = arith.constant 0 : index
    %1 = vector.load %arg1[%c0, %c0_0] : memref<1x289xi32, #tpu.memory_space<vmem>>, vector<1x289xi32>
    %2 = vector.broadcast %1 : vector<1x289xi32> to vector<52x289xi32>
    %3 = arith.cmpi eq, %0, %2 : vector<52x289xi32>
    %4 = arith.extui %3 : vector<52x289xi1> to vector<52x289xi32>
    %5 = arith.sitofp %4 : vector<52x289xi32> to vector<52x289xf32>
    %c0_1 = arith.constant 0 : index
    %c0_2 = arith.constant 0 : index
    %6 = vector.load %arg0[%c0_1, %c0_2] : memref<52x8xf32, #tpu.memory_space<vmem>>, vector<52x8xf32>
    %cst = arith.constant dense<0.000000e+00> : vector<8x289xf32>
    %7 = tpu.matmul %6, %5, %cst {dimension_numbers = #tpu.dot_dimension_numbers<[0], [0], [1], [1], [0, 1, 1, 1], [], []>} : vector<52x8xf32>, vector<52x289xf32>, vector<8x289xf32> -> vector<8x289xf32>
    %c0_3 = arith.constant 0 : index
    %c0_4 = arith.constant 0 : index
    %8 = vector.load %arg2[%c0_3, %c0_4] : memref<8x289xf32, #tpu.memory_space<vmem>>, vector<8x289xf32>
    tpu.vector_store %arg2[%c0_3, %c0_4], %7 {strides = array<i32>} : memref<8x289xf32, #tpu.memory_space<vmem>>, vector<8x289xf32>,
    return
  }
}

</mosaic_0001>

<bundles_post_ra>
// kernel: relative_position_bias_pallas.1
= control target key start
LH: loop header
LB: loop body
LE: loop exit
PB: predicated region body
PF: predicated region fallthrough
CT: control target
= control target key end

     0   :  { %v11_v0 = vlaneseq  ;;  %v369_v2 = vmov 0.0   ;;  %vm370_vm0 = vmmov 0   ;;  %vm138_vm1 = vcmask 1043456   ;;  %s476_s0 = inlined_call_operand.vmem [shape: f32[52,8], index: 0, kind: input, shape index: {}]   ;;  %s477_s1 = inlined_call_operand.vmem [shape: s32[1,289], index: 1, kind: input, shape index: {}]   ;;  %s478_s2 = inlined_call_operand.vmem [shape: f32[8,289], index: 2, kind: output, shape index: {}]  }
   0x1   :  { %v95_v1 = vld [vmem:[%s476_s0] sm:$0xff]  ;;  %349 = vmatprep.subr.mxu1 %v369_v2  ;;  %212 = vmatprep.mubr.f32.mxu0 %v369_v2  ;;  %v96_v4 = vld [vmem:[%s476_s0 + $0x8] sm:$0xff]  ;;  %v97_v14 = vld [vmem:[%s476_s0 + $0x10] sm:$0xff]  ;;  %v371_v21 = vmov 1.0  }
   0x2   :  { %102 = vxpose.xlu0.b32.start [1/7] (short) (narrow) %v95_v1, 8  ;;  %v392_v3 = vshrl.u32 %v11_v0, 7  ;;  %363 = vmatprep.mubr.msk.f32.mxu1 %vm370_vm0, %v369_v2  ;;  %v19_v5 = vld [vmem:[%s477_s1] sm:$0x7]  ;;  %v98_v20 = vld [vmem:[%s476_s0 + $0x18] sm:$0xff]  ;;  %v100_v25 = vld [vmem:[%s476_s0 + $0x28] sm:$0xff] }
   0x3   :  { %v99_v24 = vld [vmem:[%s476_s0 + $0x20] sm:$0xff]  ;;  %v101_v26 = vld [vmem:[%s476_s0 + $0x30] sm:$0xf] }
   0x4   :  { %v18_v6 = vadd.s32 48, %v392_v3  ;;  %v26_v7 = vsub.s32 1, %v392_v3  ;;  %v22_v8 = vsub.s32 0, %v392_v3  ;;  %v30_v9 = vsub.s32 2, %v392_v3 }
   0x5   :  { %v17_v10 = vadd.s32 40, %v392_v3  ;;  %v16_v15 = vadd.s32 32, %v392_v3  ;;  %v15_v16 = vadd.s32 24, %v392_v3  ;;  %v14_v22 = vadd.s32 16, %v392_v3 }
   0x6   :  { %103 = vxpose.xlu0.b32.cont [2/7] (short) (narrow) %v96_v4, 8  ;;  %v406_v11 = vrot.slane %v19_v5, %v26_v7  ;;  %v408_v12 = vrot.slane %v19_v5, %v22_v8  ;;  %v410_v13 = vrot.slane %v19_v5, %v30_v9  ;;  %v13_v23 = vadd.s32 8, %v392_v3 }
   0x8   :  { %vm51_vm2 = vcmp.eq.s32.totalorder %v18_v6, %v406_v11  ;;  %vm50_vm3 = vcmp.eq.s32.totalorder %v18_v6, %v408_v12  ;;  %vm52_vm4 = vcmp.eq.s32.totalorder %v18_v6, %v410_v13  ;;  %vm48_vm5 = vcmp.eq.s32.totalorder %v17_v10, %v406_v11 }
   0x9   :  { %v316_v17 = vsel %vm51_vm2, 1.0, %v369_v2  ;;  %v315_v18 = vsel %vm50_vm3, 1.0, %v369_v2  ;;  %v317_v19 = vsel %vm52_vm4, 1.0, %v369_v2  ;;  %vm47_vm6 = vcmp.eq.s32.totalorder %v17_v10, %v408_v12 }
   0xa   :  { %104 = vxpose.xlu0.b32.cont [3/7] (short) (narrow) %v97_v14, 8  ;;  %318 = vmatprep.subr.msk.mxu0 %vm138_vm1, %v316_v17  ;;  %vm49_vm7 = vcmp.eq.s32.totalorder %v17_v10, %v410_v13  ;;  %vm45_vm8 = vcmp.eq.s32.totalorder %v16_v15, %v406_v11  ;;  %vm44_vm9 = vcmp.eq.s32.totalorder %v16_v15, %v408_v12 }
   0xb   :  { %319 = vmatpush1.msk.msra.mxu0 %vm138_vm1, %v315_v18  ;;  %350 = vmatpush3.msk.msra.mxu1 %vm138_vm1, %v317_v19  ;;  %vm46_vm10 = vcmp.eq.s32.totalorder %v16_v15, %v410_v13  ;;  %vm42_vm11 = vcmp.eq.s32.totalorder %v15_v16, %v406_v11  ;;  %vm41_vm12 = vcmp.eq.s32.totalorder %v15_v16, %v408_v12 }
   0xc   :  { %320 = vmatprep.subr.msk.mxu0 %vm48_vm5, %v371_v21  ;;  %351 = vmatprep.subr.mxu1 %v369_v2  ;;  %vm43_vm13 = vcmp.eq.s32.totalorder %v15_v16, %v410_v13  ;;  %vm39_vm14 = vcmp.eq.s32.totalorder %v14_v22, %v406_v11  ;;  %vm38_vm15 = vcmp.eq.s32.totalorder %v14_v22, %v408_v12 }
   0xd   :  { %321 = vmatpush1.msk.msra.mxu0 %vm47_vm6, %v371_v21  ;;  %352 = vmatpush3.msk.msra.mxu1 %vm49_vm7, %v371_v21  ;;  %vm40_vm0 = vcmp.eq.s32.totalorder %v14_v22, %v410_v13  ;;  %vm36_vm1 = vcmp.eq.s32.totalorder %v13_v23, %v406_v11  ;;  %vm35_vm2 = vcmp.eq.s32.totalorder %v13_v23, %v408_v12  ;;  %vm134_vm7 = vcmask 424960  }
   0xe   :  { %105 = vxpose.xlu0.b32.cont [4/7] (short) (narrow) %v98_v20, 8  ;;  %322 = vmatprep.subr.msk.mxu0 %vm45_vm8, %v371_v21  ;;  %vm37_vm3 = vcmp.eq.s32.totalorder %v13_v23, %v410_v13  ;;  %vm33_vm4 = vcmp.eq.s32.totalorder %v392_v3, %v406_v11  ;;  %vm32_vm5 = vcmp.eq.s32.totalorder %v392_v3, %v408_v12  ;;  %vm291_vm8 = vcmask 269312  }
   0xf   :  { %353 = vmatprep.subr.mxu1 %v369_v2  ;;  %323 = vmatpush1.msk.msra.mxu0 %vm44_vm9, %v371_v21  ;;  %vm34_vm6 = vcmp.eq.s32.totalorder %v392_v3, %v410_v13 }
  0x10   :  { %354 = vmatpush3.msk.msra.mxu1 %vm46_vm10, %v371_v21  ;;  %324 = vmatprep.subr.msk.mxu0 %vm42_vm11, %v371_v21 }
  0x11   :  { %355 = vmatprep.subr.mxu1 %v369_v2  ;;  %325 = vmatpush1.msk.msra.mxu0 %vm41_vm12, %v371_v21 }
  0x12   :  { %106 = vxpose.xlu0.b32.cont [5/7] (short) (narrow) %v99_v24, 8  ;;  %356 = vmatpush3.msk.msra.mxu1 %vm43_vm13, %v371_v21 }
  0x13   :  { %326 = vmatprep.subr.msk.mxu0 %vm39_vm14, %v371_v21  ;;  %357 = vmatprep.subr.mxu1 %v369_v2 }
  0x14   :  { %327 = vmatpush1.msk.msra.mxu0 %vm38_vm15, %v371_v21  ;;  %358 = vmatpush3.msk.msra.mxu1 %vm40_vm0, %v371_v21 }
  0x15   :  { %328 = vmatprep.subr.msk.mxu0 %vm36_vm1, %v371_v21  ;;  %359 = vmatprep.subr.mxu1 %v369_v2 }
  0x16   :  { %107 = vxpose.xlu0.b32.cont [6/7] (short) (narrow) %v100_v25, 8  ;;  %329 = vmatpush1.msk.msra.mxu0 %vm35_vm2, %v371_v21 }
  0x17   :  { %360 = vmatpush3.msk.msra.mxu1 %vm37_vm3, %v371_v21  ;;  %330 = vmatprep.subr.msk.mxu0 %vm33_vm4, %v371_v21 }
  0x18   :  { %361 = vmatprep.subr.mxu1 %v369_v2  ;;  %331 = vmatpush1.msk.msra.mxu0 %vm32_vm5, %v371_v21 }
  0x19   :  { %362 = vmatpush3.msk.msra.mxu1 %vm34_vm6, %v371_v21 }
  0x1a   :  { %108 = vxpose.xlu0.b32.end [7/7] (short) (narrow) %v101_v26, 8 }
  0x7e   :  { %v118_v27 = vpop.trf.xlu0 }
  0x7f   :  { %332 = vmatmul.mubr.msk.f32.vlgmr.msra.gmra.mxu0 %vm134_vm7, %v118_v27  ;;  %364 = vmatmul.mubr.msk.f32.vlgmr.msra.gmra.mxu1 %vm134_vm7, %v118_v27 }
 0x13f   :  { %v214_v28 = vpop.f32.mrf.mxu0  ;;  %v285_v29 = vpop.f32.mrf.mxu1 }
 0x140   :  { %289 = vst [vmem:[%s478_s2] sm:$0xff] %v214_v28  ;;  %292 = vst.msk [vmem:[%s478_s2 + $0x10] sm:$0xff] %vm291_vm8, %v285_v29 }
 0x141   :  { %v216_v30 = vpop.f32.mrf.mxu0  ;;  %v365_v31 = vpop.f32.mrf.mxu1 }
 0x142   :  { %290 = vst [vmem:[%s478_s2 + $0x8] sm:$0xff] %v216_v30 }

</bundles_post_ra>
